<compile_context>
chip_gen: v6e
topology: v6e:2x2x1
jax: 0.10.0
libtpu: 0.0.40
codegen_flags: <defaults>
</compile_context>

<pallas_src>
import functools

import jax
import jax.numpy as jnp
from jax.experimental import pallas as pl
from jax.experimental.pallas import tpu as pltpu

_LANE = 128
_SUBLANE = 8
_PAD_MAGNITUDE = 1e4   # finite sentinel: softplus(-1e4) == 0 exactly in f32


def _round_up(x, m):
    return ((x + m - 1) // m) * m


def _num_tensorcores():
    """Best-effort TensorCore count of the local chip (v7x has 2)."""
    try:
        dev = jax.devices()[0]
        if getattr(dev, "platform", "") != "tpu":
            return 1
        kind = str(getattr(dev, "device_kind", "")).lower()
        if "v7" in kind:
            return 2
    except Exception:
        pass
    return 1


def _make_kernel(tile_r):
    def kernel(real_ref, fake_ref, out_ref):
        i = pl.program_id(1)  # "arbitrary" reduction axis (last grid axis)

        # Output block is the resident accumulator across the reduction axis.
        @pl.when(i == 0)
        def _():
            out_ref[...] = jnp.zeros_like(out_ref)

        # Cast to f32 inside the kernel (keeps the HBM->VMEM DMA narrow for
        # bf16 inputs; v5e VPU/EUP have no bf16 path anyway).
        r = real_ref[...].astype(jnp.float32)
        f = fake_ref[...].astype(jnp.float32)

        # BCEWithLogitsLoss(x, y) = max(x,0) - x*y + log1p(exp(-|x|))
        #   real branch (y=1): softplus(-x) = max(x,0) - x + log1p(exp(-|x|))
        #   fake branch (y=0): softplus( x) = max(x,0)     + log1p(exp(-|x|))
        # Sentinel-padded tail elements (+1e4 real / -1e4 fake) give exactly 0,
        # so no masking is needed in the hot loop.
        loss = (jnp.maximum(r, 0.0) - r + jnp.log1p(jnp.exp(-jnp.abs(r)))
                + jnp.maximum(f, 0.0) + jnp.log1p(jnp.exp(-jnp.abs(f))))

        # Fold (tile_r, 128) into the (8, 128) accumulator with plain
        # elementwise vreg adds (layout-preserving reshape, no XLU here).
        partial = jnp.sum(
            loss.reshape(tile_r // _SUBLANE, _SUBLANE, _LANE), axis=0)
        out_ref[...] += partial[None]

    return kernel


def gan_loss(real_output, fake_output, *, max_rows_per_tile=2048,
             num_cores=None):
    """JAX/Pallas equivalent of GAN_loss.forward.

    real_output, fake_output: (B, 1) logits (any float dtype; passed to the
    kernel in their native dtype).  Returns a scalar f32 loss
    0.5 * (BCE(real, ones) + BCE(fake, zeros)).
    """
    real = jnp.squeeze(real_output, axis=1)
    fake = jnp.squeeze(fake_output, axis=1)
    n = real.shape[0]
    assert fake.shape[0] == n

    if num_cores is None:
        num_cores = _num_tensorcores()

    # ---- tiling choices (static, shape-derived) -------------------------
    rows_min = _round_up(max(pl.cdiv(n, _LANE), 1), _SUBLANE)
    max_rows_per_tile = _round_up(max(max_rows_per_tile, _SUBLANE), _SUBLANE)

    if num_cores >= 2 and rows_min >= 2 * _SUBLANE:
        split = 2                                  # one half per TensorCore
        rows_per_split = _round_up(pl.cdiv(rows_min, 2), _SUBLANE)
    else:
        split = 1                                  # single-TC chips: no overhead
        rows_per_split = rows_min

    tile_r = min(max_rows_per_tile, rows_per_split)
    tiles_per_split = pl.cdiv(rows_per_split, tile_r)
    total_rows = split * tiles_per_split * tile_r
    total_elems = total_rows * _LANE

    def to_slab(x, pad_value):
        # Native dtype, sentinel pad, sublane/lane-dense (rows, 128) layout.
        flat = x.reshape(-1)
        return jnp.pad(flat, (0, total_elems - n),
                       constant_values=pad_value).reshape(total_rows, _LANE)

    real2d = to_slab(real, _PAD_MAGNITUDE)    # softplus(-pad) == 0
    fake2d = to_slab(fake, -_PAD_MAGNITUDE)   # softplus(+pad) == 0

    in_spec = pl.BlockSpec((tile_r, _LANE),
                           lambda c, i: (c * tiles_per_split + i, 0))
    out_spec = pl.BlockSpec((1, _SUBLANE, _LANE), lambda c, i: (c, 0, 0))

    # Only widen the scoped-VMEM limit if a user-chosen tile approaches the
    # v5e 16 MiB default (2 inputs x 2 buffers x tile).
    itemsize = max(jnp.dtype(real2d.dtype).itemsize,
                   jnp.dtype(fake2d.dtype).itemsize)
    vmem_needed = (2 * 2 * tile_r * _LANE * itemsize
                   + 2 * _SUBLANE * _LANE * 4)
    cp_kwargs = dict(dimension_semantics=("parallel", "arbitrary"))
    if vmem_needed > 12 * 1024 * 1024:
        cp_kwargs["vmem_limit_bytes"] = int(min(vmem_needed + (4 << 20),
                                                60 << 20))

    partials = pl.pallas_call(
        _make_kernel(tile_r),
        out_shape=jax.ShapeDtypeStruct((split, _SUBLANE, _LANE), jnp.float32),
        grid=(split, tiles_per_split),
        in_specs=[in_spec, in_spec],
        out_specs=out_spec,
        compiler_params=pltpu.CompilerParams(**cp_kwargs),
    )(real2d, fake2d)

    # Single tiny epilogue reduce; one constant multiply folds both means and
    # the leading 0.5.
    return jnp.sum(partials) * (0.5 / n)


def _reference(real_output, fake_output):
    # Pure-JAX reference of the PyTorch module.
    r = jnp.squeeze(real_output, axis=1).astype(jnp.float32)
    f = jnp.squeeze(fake_output, axis=1).astype(jnp.float32)
    bce_ones = jnp.mean(jnp.maximum(r, 0.0) - r + jnp.log1p(jnp.exp(-jnp.abs(r))))
    bce_zeros = jnp.mean(jnp.maximum(f, 0.0) + jnp.log1p(jnp.exp(-jnp.abs(f))))
    return 0.5 * (bce_ones + bce_zeros)


if __name__ == "__main__":
    key = jax.random.PRNGKey(0)
    k1, k2, k3, k4 = jax.random.split(key, 4)

    gan_loss_jit = jax.jit(
        functools.partial(gan_loss),
        static_argnames=("max_rows_per_tile", "num_cores"))

    # Case 1: small f32 batch of (B, 1) discriminator logits (default tiling,
    # split chosen from the local chip's TensorCore count).
    B = 8
    real_output = jax.random.normal(k1, (B, 1), dtype=jnp.float32) * 2.0
    fake_output = jax.random.normal(k2, (B, 1), dtype=jnp.float32) * 2.0
    loss = jax.block_until_ready(gan_loss_jit(real_output, fake_output))
    ref = _reference(real_output, fake_output)
    assert jnp.allclose(loss, ref, atol=1e-5, rtol=1e-5), (loss, ref)

    # Case 2: bf16 logits, ragged size, tiny tiles, forced 2-way "parallel"
    # split -> exercises the multi-tile grid, the split axis, native-dtype
    # DMA and the sentinel-padded tail.
    B2 = 5000
    real2 = (jax.random.normal(k3, (B2, 1), dtype=jnp.float32) * 2.0).astype(jnp.bfloat16)
    fake2 = (jax.random.normal(k4, (B2, 1), dtype=jnp.float32) * 2.0).astype(jnp.bfloat16)
    loss2 = jax.block_until_ready(
        gan_loss_jit(real2, fake2, max_rows_per_tile=8, num_cores=2))
    ref2 = _reference(real2, fake2)
    assert jnp.allclose(loss2, ref2, atol=1e-4, rtol=1e-4), (loss2, ref2)

    print("KERNEL_OK")
</pallas_src>

<mosaic_0001>
module attributes {stable_mosaic.version = 11 : i64} {
  func.func @kernel(%arg0: i32, %arg1: i32, %arg2: memref<8x128xf32, #tpu.memory_space<vmem>>, %arg3: memref<8x128xf32, #tpu.memory_space<vmem>>, %arg4: memref<1x8x128xf32, #tpu.memory_space<vmem>>) attributes {dimension_semantics = [#tpu.dimension_semantics<parallel>, #tpu.dimension_semantics<arbitrary>], iteration_bounds = array<i64: 1, 1>, scalar_prefetch = 0 : i64, scratch_operands = 0 : i64, tpu.core_type = #tpu.core_type<tc>, window_params = [{transform_indices = @transform_0, window_bounds = array<i64: 8, 128>}, {transform_indices = @transform_1, window_bounds = array<i64: 8, 128>}, {transform_indices = @transform_2, window_bounds = array<i64: 1, 8, 128>}]} {
    %c0_i32 = arith.constant 0 : i32
    %0 = arith.cmpi eq, %arg1, %c0_i32 : i32
    %1 = arith.extui %0 : i1 to i32
    %c0_i32_0 = arith.constant 0 : i32
    %2 = arith.cmpi ne, %1, %c0_i32_0 : i32
    scf.if %2 {
      %cst_14 = arith.constant 0.000000e+00 : f32
      %29 = vector.broadcast %cst_14 : f32 to vector<1x8x128xf32>
      %c0_15 = arith.constant 0 : index
      %c0_16 = arith.constant 0 : index
      %c0_17 = arith.constant 0 : index
      %30 = vector.load %arg4[%c0_15, %c0_16, %c0_17] : memref<1x8x128xf32, #tpu.memory_space<vmem>>, vector<1x8x128xf32>
      tpu.vector_store %arg4[%c0_15, %c0_16, %c0_17], %29 {strides = array<i32>} : memref<1x8x128xf32, #tpu.memory_space<vmem>>, vector<1x8x128xf32>,
    } else {
    }
    %c0 = arith.constant 0 : index
    %c0_1 = arith.constant 0 : index
    %3 = vector.load %arg2[%c0, %c0_1] : memref<8x128xf32, #tpu.memory_space<vmem>>, vector<8x128xf32>
    %c0_2 = arith.constant 0 : index
    %c0_3 = arith.constant 0 : index
    %4 = vector.load %arg3[%c0_2, %c0_3] : memref<8x128xf32, #tpu.memory_space<vmem>>, vector<8x128xf32>
    %cst = arith.constant 0.000000e+00 : f32
    %5 = vector.broadcast %cst : f32 to vector<8x128xf32>
    %6 = arith.maximumf %3, %5 : vector<8x128xf32>
    %7 = arith.subf %6, %3 : vector<8x128xf32>
    %8 = math.absf %3 : vector<8x128xf32>
    %cst_4 = arith.constant 0.000000e+00 : f32
    %9 = vector.broadcast %cst_4 : f32 to vector<8x128xf32>
    %10 = arith.subf %9, %8 : vector<8x128xf32>
    %11 = math.exp %10 : vector<8x128xf32>
    %12 = math.log1p %11 : vector<8x128xf32>
    %13 = arith.addf %7, %12 : vector<8x128xf32>
    %cst_5 = arith.constant 0.000000e+00 : f32
    %14 = vector.broadcast %cst_5 : f32 to vector<8x128xf32>
    %15 = arith.maximumf %4, %14 : vector<8x128xf32>
    %16 = arith.addf %13, %15 : vector<8x128xf32>
    %17 = math.absf %4 : vector<8x128xf32>
    %cst_6 = arith.constant 0.000000e+00 : f32
    %18 = vector.broadcast %cst_6 : f32 to vector<8x128xf32>
    %19 = arith.subf %18, %17 : vector<8x128xf32>
    %20 = math.exp %19 : vector<8x128xf32>
    %21 = math.log1p %20 : vector<8x128xf32>
    %22 = arith.addf %16, %21 : vector<8x128xf32>
    %23 = vector.shape_cast %22 : vector<8x128xf32> to vector<1x8x128xf32>
    %cst_7 = arith.constant dense<0.000000e+00> : vector<8x128xf32>
    %24 = vector.multi_reduction <add>, %23, %cst_7 [0] : vector<1x8x128xf32> to vector<8x128xf32>
    %c0_8 = arith.constant 0 : index
    %c0_9 = arith.constant 0 : index
    %c0_10 = arith.constant 0 : index
    %25 = vector.load %arg4[%c0_8, %c0_9, %c0_10] : memref<1x8x128xf32, #tpu.memory_space<vmem>>, vector<1x8x128xf32>
    %26 = vector.shape_cast %24 : vector<8x128xf32> to vector<1x8x128xf32>
    %27 = arith.addf %25, %26 : vector<1x8x128xf32>
    %c0_11 = arith.constant 0 : index
    %c0_12 = arith.constant 0 : index
    %c0_13 = arith.constant 0 : index
    %28 = vector.load %arg4[%c0_11, %c0_12, %c0_13] : memref<1x8x128xf32, #tpu.memory_space<vmem>>, vector<1x8x128xf32>
    tpu.vector_store %arg4[%c0_11, %c0_12, %c0_13], %27 {strides = array<i32>} : memref<1x8x128xf32, #tpu.memory_space<vmem>>, vector<1x8x128xf32>,
    return
  }
  func.func @transform_0(%arg0: i32, %arg1: i32) -> (i32, i32) {
    %c1_i32 = arith.constant 1 : i32
    %0 = arith.muli %arg0, %c1_i32 : i32
    %1 = arith.addi %0, %arg1 : i32
    %c0_i32 = arith.constant 0 : i32
    %c0_i32_0 = arith.constant 0 : i32
    return %1, %c0_i32 : i32, i32
  }
  func.func @transform_1(%arg0: i32, %arg1: i32) -> (i32, i32) {
    %c1_i32 = arith.constant 1 : i32
    %0 = arith.muli %arg0, %c1_i32 : i32
    %1 = arith.addi %0, %arg1 : i32
    %c0_i32 = arith.constant 0 : i32
    %c0_i32_0 = arith.constant 0 : i32
    return %1, %c0_i32 : i32, i32
  }
  func.func @transform_2(%arg0: i32, %arg1: i32) -> (i32, i32, i32) {
    %c0_i32 = arith.constant 0 : i32
    %c0_i32_0 = arith.constant 0 : i32
    %c0_i32_1 = arith.constant 0 : i32
    return %arg0, %c0_i32, %c0_i32_0 : i32, i32, i32
  }
}

</mosaic_0001>

<bundles_post_ra>
// kernel: gan_loss.1
= control target key start
LH: loop header
LB: loop body
LE: loop exit
PB: predicated region body
PF: predicated region fallthrough
CT: control target
= control target key end

     0   :  { %s137_s0 = inlined_call_operand.vmem [shape: f32[8,128], index: 0, kind: input, shape index: {}]   ;;  %s138_s1 = inlined_call_operand.vmem [shape: f32[8,128], index: 1, kind: input, shape index: {}]   ;;  %s139_s2 = inlined_call_operand.vmem [shape: f32[1,8,128], index: 2, kind: output, shape index: {}]  }
   0x1   :  { %v50_v0 = vld [vmem:[%s137_s0] sm:$0xff] }
   0x2   :  { %v51_v1 = vld [vmem:[%s138_s1] sm:$0xff]  ;;  %v54_v2 = vand.u32 2147483647, %v50_v0  ;;  %v52_v15 = vmax.f32 %v50_v0, 0.0 }
   0x3   :  { %v70_v3 = vand.u32 2147483647, %v51_v1  ;;  %v68_v25 = vmax.f32 %v51_v1, 0.0 }
   0x4   :  { %v55_v4 = vsub.f32 0.0, %v54_v2  ;;  %v53_v21 = vsub.f32 %v52_v15, %v50_v0 }
   0x5   :  { %v71_v5 = vsub.f32 0.0, %v70_v3 }
   0x6   :  { %v56_v6 = vmul.f32 1.442695, %v55_v4 }
   0x7   :  { %v72_v7 = vmul.f32 1.442695, %v71_v5 }
   0x8   :  { %105 = vpow2.f32 %v56_v6 }
   0x9   :  { %107 = vpow2.f32 %v72_v7 }
  0x15   :  { %v106_v8 = vpop.eup %105 }
  0x16   :  { %v108_v9 = vpop.eup %107  ;;  %v58_v10 = vadd.f32 1.0, %v106_v8  ;;  %v61_v12 = vmul.f32 -0.5, %v106_v8  ;;  %v64_v16 = vand.u32 2147483647, %v106_v8 }
  0x17   :  { %v74_v11 = vadd.f32 1.0, %v108_v9  ;;  %v77_v13 = vmul.f32 -0.5, %v108_v9  ;;  %v80_v18 = vand.u32 2147483647, %v108_v9 }
  0x18   :  { %109 = vlog2.f32 %v58_v10  ;;  %v62_v14 = vadd.f32 1.0, %v61_v12  ;;  %vm65_vm0 = vcmp.lt.f32.partialorder %v64_v16, 0.0004427343 }
  0x19   :  { %111 = vlog2.f32 %v74_v11  ;;  %v78_v17 = vadd.f32 1.0, %v77_v13  ;;  %vm81_vm1 = vcmp.lt.f32.partialorder %v80_v18, 0.0004427343 }
  0x1a   :  { %v63_v19 = vmul.f32 %v106_v8, %v62_v14 }
  0x1b   :  { %v79_v24 = vmul.f32 %v108_v9, %v78_v17 }
  0x25   :  { %v110_v20 = vpop.eup %109 }
  0x26   :  { %v112_v22 = vpop.eup %111  ;;  %v60_v23 = vmul.f32 0.6931472, %v110_v20 }
  0x27   :  { %v76_v26 = vmul.f32 0.6931472, %v112_v22 }
  0x28   :  { %v66_v27 = vsel %vm65_vm0, %v63_v19, %v60_v23 }
  0x29   :  { %v67_v28 = vadd.f32 %v66_v27, %v53_v21  ;;  %v82_v29 = vsel %vm81_vm1, %v79_v24, %v76_v26 }
  0x2b   :  { %v69_v30 = vadd.f32 %v68_v25, %v67_v28 }
  0x2d   :  { %v83_v31 = vadd.f32 %v82_v29, %v69_v30 }
  0x2f   :  { %87 = vst [vmem:[%s139_s2] sm:$0xff] %v83_v31 }

</bundles_post_ra>
